<compile_context>
chip_gen: v7x
topology: tpu7x:2x2x1
jax: 0.10.0
libtpu: 0.0.40
codegen_flags: <defaults>
</compile_context>

<pallas_src>
import jax
import jax.numpy as jnp
from jax import lax
from jax.experimental import pallas as pl
from jax.experimental.pallas import tpu as pltpu

FACTOR_MF = 32                    # factor_num_mf
LAYERS = [64, 32, 16, 8]          # self.layers
FACTOR_MLP = LAYERS[0] // 2       # 32
EMB_W = FACTOR_MLP + FACTOR_MF    # 64 — merged [mlp | mf] embedding row width

_MAX_TILE_B = 4096                # per-tile batch cap (f32 tiles, 2x-buffered ≈ 4 MiB VMEM)


def neumf_kernel(user_ref, item_ref,
                 w1u_ref, w1i_ref, b1_ref, w2_ref, b2_ref, w3_ref, b3_ref,
                 wa_h_ref, wa_mf_ref, ba_ref, out_ref):
    # user_ref / item_ref: (T, 64) merged-embedding tiles, batch on sublanes.
    u = user_ref[...]
    it = item_ref[...]
    u_mlp, u_mf = u[:, :FACTOR_MLP], u[:, FACTOR_MLP:]
    i_mlp, i_mf = it[:, :FACTOR_MLP], it[:, FACTOR_MLP:]

    def dot_rhs_t(w, x):
        # (out, k) contracted with (T, k) on the feature axis -> (out, T):
        # the MXU matmul itself flips the batch onto the lane axis, so no
        # explicit HBM/XLA transpose of the activations is ever needed.
        return lax.dot_general(w, x, (((1,), (1,)), ((), ())),
                               preferred_element_type=jnp.float32)

    # fc1 on split weights (no (64, T) concat is materialized).
    h = (dot_rhs_t(w1u_ref[...], u_mlp)
         + dot_rhs_t(w1i_ref[...], i_mlp)
         + b1_ref[...])
    h = jnp.maximum(h, 0.0)                                            # (32, T)
    h = jnp.dot(w2_ref[...], h, preferred_element_type=jnp.float32) + b2_ref[...]
    h = jnp.maximum(h, 0.0)                                            # (16, T)
    h = jnp.dot(w3_ref[...], h, preferred_element_type=jnp.float32) + b3_ref[...]
    h = jnp.maximum(h, 0.0)                                            # (8, T)

    # MF branch: elementwise product of the MF halves (batch on sublanes).
    mf = u_mf * i_mf                                                   # (T, 32)

    # Affine head with split weights (no concat): MLP half via VPU multiply +
    # sublane reduce; MF half via an M=1, K=32 matmul that also flips it to
    # the lane-dense (1, T) layout.
    logits = (jnp.sum(h * wa_h_ref[...], axis=0, keepdims=True)
              + dot_rhs_t(wa_mf_ref[...], mf)
              + ba_ref[...])                                           # (1, T)
    out_ref[...] = jax.nn.sigmoid(logits)


def _choose_tile_b(batch):
    if batch <= 256:
        return batch                       # one full-batch tile, block == array
    # At least two grid steps so both v7x TensorCores get work; tiles are
    # 256-aligned (MXU width, lane multiple) and capped at _MAX_TILE_B.
    half = -(-batch // 2)
    tile = -(-half // 256) * 256
    return min(tile, _MAX_TILE_B)


def neumf_forward(params, user_indices, item_indices):
    """Embedding gather (XLA glue) + tiled Pallas kernel for the dense hot path."""
    B = user_indices.shape[0]

    # Two merged-table gathers (256 B rows); no concat / transpose / pad.
    user_rows = params["emb_user"][user_indices]              # (B, 64)
    item_rows = params["emb_item"][item_indices]              # (B, 64)

    # Tiny weight reshapes (negligible): PyTorch (out, in) layout kept; first
    # layer split into user/item halves; affine head split into MLP/MF halves.
    w1 = params["w1"]
    w1u, w1i = w1[:, :FACTOR_MLP], w1[:, FACTOR_MLP:]          # (32, 32) each
    b1 = params["b1"].reshape(-1, 1)                           # (32, 1)
    w2, b2 = params["w2"], params["b2"].reshape(-1, 1)         # (16, 32), (16, 1)
    w3, b3 = params["w3"], params["b3"].reshape(-1, 1)         # (8, 16), (8, 1)
    wa_h = params["wa"][:, :LAYERS[-1]].T                      # (8, 1)
    wa_mf = params["wa"][:, LAYERS[-1]:]                       # (1, 32)
    ba = params["ba"].reshape(1, 1)                            # (1, 1)

    tile_b = _choose_tile_b(B)
    grid = (-(-B // tile_b),)

    act_spec = pl.BlockSpec((tile_b, EMB_W), lambda i: (i, 0))

    def res_spec(shape):                                       # VMEM-resident weight
        return pl.BlockSpec(shape, lambda i: (0, 0))

    out = pl.pallas_call(
        neumf_kernel,
        out_shape=jax.ShapeDtypeStruct((1, B), jnp.float32),
        grid=grid,
        in_specs=[
            act_spec,                      # user rows (tile_b, 64)
            act_spec,                      # item rows (tile_b, 64)
            res_spec(w1u.shape), res_spec(w1i.shape), res_spec(b1.shape),
            res_spec(w2.shape), res_spec(b2.shape),
            res_spec(w3.shape), res_spec(b3.shape),
            res_spec(wa_h.shape), res_spec(wa_mf.shape), res_spec(ba.shape),
        ],
        out_specs=pl.BlockSpec((1, tile_b), lambda i: (0, i)),
        compiler_params=pltpu.CompilerParams(
            dimension_semantics=("parallel",)),
    )(user_rows, item_rows, w1u, w1i, b1, w2, b2, w3, b3, wa_h, wa_mf, ba)

    return out.T                                               # (B, 1)


def xavier_uniform(key, fan_out, fan_in):
    # PyTorch nn.Linear weight layout is (out_features, in_features).
    bound = (6.0 / (fan_in + fan_out)) ** 0.5
    return jax.random.uniform(key, (fan_out, fan_in), jnp.float32, -bound, bound)


def init_params(key, num_users, num_items):
    ks = jax.random.split(key, 6)
    return {
        # Merged embedding tables [mlp | mf]; nn.init.normal_(std=0.01).
        "emb_user": 0.01 * jax.random.normal(ks[0], (num_users, EMB_W), jnp.float32),
        "emb_item": 0.01 * jax.random.normal(ks[1], (num_items, EMB_W), jnp.float32),
        # fc_layers: Linear weights (out, in), xavier_uniform, zero bias.
        "w1": xavier_uniform(ks[2], LAYERS[1], LAYERS[0]),
        "b1": jnp.zeros((LAYERS[1],), jnp.float32),
        "w2": xavier_uniform(ks[3], LAYERS[2], LAYERS[1]),
        "b2": jnp.zeros((LAYERS[2],), jnp.float32),
        "w3": xavier_uniform(ks[4], LAYERS[3], LAYERS[2]),
        "b3": jnp.zeros((LAYERS[3],), jnp.float32),
        # affine_output: Linear(8 + 32 -> 1).
        "wa": xavier_uniform(ks[5], 1, LAYERS[-1] + FACTOR_MF),
        "ba": jnp.zeros((1,), jnp.float32),
    }


def reference_forward(params, user_indices, item_indices):
    """Plain-JAX reference replicating the PyTorch forward exactly."""
    u = params["emb_user"][user_indices]
    it = params["emb_item"][item_indices]
    u_mlp, u_mf = u[:, :FACTOR_MLP], u[:, FACTOR_MLP:]
    i_mlp, i_mf = it[:, :FACTOR_MLP], it[:, FACTOR_MLP:]
    mlp = jnp.concatenate([u_mlp, i_mlp], axis=-1)
    mf = u_mf * i_mf
    h = jnp.maximum(mlp @ params["w1"].T + params["b1"], 0.0)
    h = jnp.maximum(h @ params["w2"].T + params["b2"], 0.0)
    h = jnp.maximum(h @ params["w3"].T + params["b3"], 0.0)
    vec = jnp.concatenate([h, mf], axis=-1)
    return jax.nn.sigmoid(vec @ params["wa"].T + params["ba"])


if __name__ == "__main__":
    key = jax.random.PRNGKey(0)
    num_users, num_items, batch = 50, 100, 8

    pkey, ukey, ikey, rkey = jax.random.split(key, 4)
    params = init_params(pkey, num_users, num_items)

    # forward() only consumes user_indices, item_indices, target_movie_rating;
    # the remaining tuple members are pass-through / unused.
    user_indices = jax.random.randint(ukey, (batch,), 0, num_users)
    item_indices = jax.random.randint(ikey, (batch,), 0, num_items)
    target_movie_rating = jax.random.randint(rkey, (batch,), 1, 6)

    fwd = jax.jit(neumf_forward)
    rating = fwd(params, user_indices, item_indices)
    target = target_movie_rating.astype(jnp.float32)   # second return value
    jax.block_until_ready((rating, target))

    ref = reference_forward(params, user_indices, item_indices)
    assert rating.shape == (batch, 1)
    assert jnp.allclose(rating, ref, atol=1e-5, rtol=1e-5), \
        float(jnp.max(jnp.abs(rating - ref)))
    print("KERNEL_OK")
</pallas_src>

<mosaic_0001>
module attributes {stable_mosaic.version = 11 : i64} {
  func.func @neumf_kernel(%arg0: i32, %arg1: memref<8x64xf32, #tpu.memory_space<vmem>>, %arg2: memref<8x64xf32, #tpu.memory_space<vmem>>, %arg3: memref<32x32xf32, #tpu.memory_space<vmem>>, %arg4: memref<32x32xf32, #tpu.memory_space<vmem>>, %arg5: memref<32x1xf32, #tpu.memory_space<vmem>>, %arg6: memref<16x32xf32, #tpu.memory_space<vmem>>, %arg7: memref<16x1xf32, #tpu.memory_space<vmem>>, %arg8: memref<8x16xf32, #tpu.memory_space<vmem>>, %arg9: memref<8x1xf32, #tpu.memory_space<vmem>>, %arg10: memref<8x1xf32, #tpu.memory_space<vmem>>, %arg11: memref<1x32xf32, #tpu.memory_space<vmem>>, %arg12: memref<1x1xf32, #tpu.memory_space<vmem>>, %arg13: memref<1x8xf32, #tpu.memory_space<vmem>>) attributes {dimension_semantics = [#tpu.dimension_semantics<parallel>], iteration_bounds = array<i64: 1>, scalar_prefetch = 0 : i64, scratch_operands = 0 : i64, tpu.core_type = #tpu.core_type<tc>, window_params = [{transform_indices = @transform_0, window_bounds = array<i64: 8, 64>}, {transform_indices = @transform_1, window_bounds = array<i64: 8, 64>}, {pipeline_mode = #tpu.pipeline_mode<synchronous>, transform_indices = @transform_2, window_bounds = array<i64: 32, 32>}, {pipeline_mode = #tpu.pipeline_mode<synchronous>, transform_indices = @transform_3, window_bounds = array<i64: 32, 32>}, {pipeline_mode = #tpu.pipeline_mode<synchronous>, transform_indices = @transform_4, window_bounds = array<i64: 32, 1>}, {pipeline_mode = #tpu.pipeline_mode<synchronous>, transform_indices = @transform_5, window_bounds = array<i64: 16, 32>}, {pipeline_mode = #tpu.pipeline_mode<synchronous>, transform_indices = @transform_6, window_bounds = array<i64: 16, 1>}, {pipeline_mode = #tpu.pipeline_mode<synchronous>, transform_indices = @transform_7, window_bounds = array<i64: 8, 16>}, {pipeline_mode = #tpu.pipeline_mode<synchronous>, transform_indices = @transform_8, window_bounds = array<i64: 8, 1>}, {pipeline_mode = #tpu.pipeline_mode<synchronous>, transform_indices = @transform_9, window_bounds = array<i64: 8, 1>}, {pipeline_mode = #tpu.pipeline_mode<synchronous>, transform_indices = @transform_10, window_bounds = array<i64: 1, 32>}, {pipeline_mode = #tpu.pipeline_mode<synchronous>, transform_indices = @transform_11, window_bounds = array<i64: 1, 1>}, {transform_indices = @transform_12, window_bounds = array<i64: 1, 8>}]} {
    %c0 = arith.constant 0 : index
    %c0_0 = arith.constant 0 : index
    %0 = vector.load %arg1[%c0, %c0_0] : memref<8x64xf32, #tpu.memory_space<vmem>>, vector<8x64xf32>
    %c0_1 = arith.constant 0 : index
    %c0_2 = arith.constant 0 : index
    %1 = vector.load %arg2[%c0_1, %c0_2] : memref<8x64xf32, #tpu.memory_space<vmem>>, vector<8x64xf32>
    %2 = vector.extract_strided_slice %0 {offsets = [0, 0], sizes = [8, 32], strides = [1, 1]} : vector<8x64xf32> to vector<8x32xf32>
    %3 = vector.extract_strided_slice %0 {offsets = [0, 32], sizes = [8, 32], strides = [1, 1]} : vector<8x64xf32> to vector<8x32xf32>
    %4 = vector.extract_strided_slice %1 {offsets = [0, 0], sizes = [8, 32], strides = [1, 1]} : vector<8x64xf32> to vector<8x32xf32>
    %5 = vector.extract_strided_slice %1 {offsets = [0, 32], sizes = [8, 32], strides = [1, 1]} : vector<8x64xf32> to vector<8x32xf32>
    %c0_3 = arith.constant 0 : index
    %c0_4 = arith.constant 0 : index
    %6 = vector.load %arg3[%c0_3, %c0_4] : memref<32x32xf32, #tpu.memory_space<vmem>>, vector<32x32xf32>
    %cst = arith.constant dense<0.000000e+00> : vector<32x8xf32>
    %7 = tpu.matmul %6, %2, %cst {dimension_numbers = #tpu.dot_dimension_numbers<[1], [1], [0], [0], [0, 0, 1, 0], [], []>} : vector<32x32xf32>, vector<8x32xf32>, vector<32x8xf32> -> vector<32x8xf32>
    %c0_5 = arith.constant 0 : index
    %c0_6 = arith.constant 0 : index
    %8 = vector.load %arg4[%c0_5, %c0_6] : memref<32x32xf32, #tpu.memory_space<vmem>>, vector<32x32xf32>
    %cst_7 = arith.constant dense<0.000000e+00> : vector<32x8xf32>
    %9 = tpu.matmul %8, %4, %cst_7 {dimension_numbers = #tpu.dot_dimension_numbers<[1], [1], [0], [0], [0, 0, 1, 0], [], []>} : vector<32x32xf32>, vector<8x32xf32>, vector<32x8xf32> -> vector<32x8xf32>
    %10 = arith.addf %7, %9 : vector<32x8xf32>
    %c0_8 = arith.constant 0 : index
    %c0_9 = arith.constant 0 : index
    %11 = vector.load %arg5[%c0_8, %c0_9] : memref<32x1xf32, #tpu.memory_space<vmem>>, vector<32x1xf32>
    %12 = vector.broadcast %11 : vector<32x1xf32> to vector<32x8xf32>
    %13 = arith.addf %10, %12 : vector<32x8xf32>
    %cst_10 = arith.constant 0.000000e+00 : f32
    %14 = vector.broadcast %cst_10 : f32 to vector<32x8xf32>
    %15 = arith.maximumf %13, %14 : vector<32x8xf32>
    %c0_11 = arith.constant 0 : index
    %c0_12 = arith.constant 0 : index
    %16 = vector.load %arg6[%c0_11, %c0_12] : memref<16x32xf32, #tpu.memory_space<vmem>>, vector<16x32xf32>
    %cst_13 = arith.constant dense<0.000000e+00> : vector<16x8xf32>
    %17 = tpu.matmul %16, %15, %cst_13 {dimension_numbers = #tpu.dot_dimension_numbers<[1], [0], [0], [1], [0, 0, 1, 1], [], []>} : vector<16x32xf32>, vector<32x8xf32>, vector<16x8xf32> -> vector<16x8xf32>
    %c0_14 = arith.constant 0 : index
    %c0_15 = arith.constant 0 : index
    %18 = vector.load %arg7[%c0_14, %c0_15] : memref<16x1xf32, #tpu.memory_space<vmem>>, vector<16x1xf32>
    %19 = vector.broadcast %18 : vector<16x1xf32> to vector<16x8xf32>
    %20 = arith.addf %17, %19 : vector<16x8xf32>
    %cst_16 = arith.constant 0.000000e+00 : f32
    %21 = vector.broadcast %cst_16 : f32 to vector<16x8xf32>
    %22 = arith.maximumf %20, %21 : vector<16x8xf32>
    %c0_17 = arith.constant 0 : index
    %c0_18 = arith.constant 0 : index
    %23 = vector.load %arg8[%c0_17, %c0_18] : memref<8x16xf32, #tpu.memory_space<vmem>>, vector<8x16xf32>
    %cst_19 = arith.constant dense<0.000000e+00> : vector<8x8xf32>
    %24 = tpu.matmul %23, %22, %cst_19 {dimension_numbers = #tpu.dot_dimension_numbers<[1], [0], [0], [1], [0, 0, 1, 1], [], []>} : vector<8x16xf32>, vector<16x8xf32>, vector<8x8xf32> -> vector<8x8xf32>
    %c0_20 = arith.constant 0 : index
    %c0_21 = arith.constant 0 : index
    %25 = vector.load %arg9[%c0_20, %c0_21] : memref<8x1xf32, #tpu.memory_space<vmem>>, vector<8x1xf32>
    %26 = vector.broadcast %25 : vector<8x1xf32> to vector<8x8xf32>
    %27 = arith.addf %24, %26 : vector<8x8xf32>
    %cst_22 = arith.constant 0.000000e+00 : f32
    %28 = vector.broadcast %cst_22 : f32 to vector<8x8xf32>
    %29 = arith.maximumf %27, %28 : vector<8x8xf32>
    %30 = arith.mulf %3, %5 : vector<8x32xf32>
    %c0_23 = arith.constant 0 : index
    %c0_24 = arith.constant 0 : index
    %31 = vector.load %arg10[%c0_23, %c0_24] : memref<8x1xf32, #tpu.memory_space<vmem>>, vector<8x1xf32>
    %32 = vector.broadcast %31 : vector<8x1xf32> to vector<8x8xf32>
    %33 = arith.mulf %29, %32 : vector<8x8xf32>
    %cst_25 = arith.constant dense<0.000000e+00> : vector<8xf32>
    %34 = vector.multi_reduction <add>, %33, %cst_25 [0] : vector<8x8xf32> to vector<8xf32>
    %35 = vector.shape_cast %34 : vector<8xf32> to vector<1x8xf32>
    %c0_26 = arith.constant 0 : index
    %c0_27 = arith.constant 0 : index
    %36 = vector.load %arg11[%c0_26, %c0_27] : memref<1x32xf32, #tpu.memory_space<vmem>>, vector<1x32xf32>
    %cst_28 = arith.constant dense<0.000000e+00> : vector<1x8xf32>
    %37 = tpu.matmul %36, %30, %cst_28 {dimension_numbers = #tpu.dot_dimension_numbers<[1], [1], [0], [0], [0, 0, 1, 0], [], []>} : vector<1x32xf32>, vector<8x32xf32>, vector<1x8xf32> -> vector<1x8xf32>
    %38 = arith.addf %35, %37 : vector<1x8xf32>
    %c0_29 = arith.constant 0 : index
    %c0_30 = arith.constant 0 : index
    %39 = vector.load %arg12[%c0_29, %c0_30] : memref<1x1xf32, #tpu.memory_space<vmem>>, vector<1x1xf32>
    %40 = vector.broadcast %39 : vector<1x1xf32> to vector<1x8xf32>
    %41 = arith.addf %38, %40 : vector<1x8xf32>
    %42 = arith.negf %41 : vector<1x8xf32>
    %43 = math.exp %42 : vector<1x8xf32>
    %cst_31 = arith.constant 1.000000e+00 : f32
    %44 = vector.broadcast %cst_31 : f32 to vector<1x8xf32>
    %45 = arith.addf %44, %43 : vector<1x8xf32>
    %46 = arith.divf %44, %45 : vector<1x8xf32>
    %c0_32 = arith.constant 0 : index
    %c0_33 = arith.constant 0 : index
    %47 = vector.load %arg13[%c0_32, %c0_33] : memref<1x8xf32, #tpu.memory_space<vmem>>, vector<1x8xf32>
    tpu.vector_store %arg13[%c0_32, %c0_33], %46 {strides = array<i32>} : memref<1x8xf32, #tpu.memory_space<vmem>>, vector<1x8xf32>,
    return
  }
  func.func @transform_0(%arg0: i32) -> (i32, i32) {
    %c0_i32 = arith.constant 0 : i32
    %c0_i32_0 = arith.constant 0 : i32
    return %arg0, %c0_i32 : i32, i32
  }
  func.func @transform_1(%arg0: i32) -> (i32, i32) {
    %c0_i32 = arith.constant 0 : i32
    %c0_i32_0 = arith.constant 0 : i32
    return %arg0, %c0_i32 : i32, i32
  }
  func.func @transform_2(%arg0: i32) -> (i32, i32) {
    %c0_i32 = arith.constant 0 : i32
    %c0_i32_0 = arith.constant 0 : i32
    %c0_i32_1 = arith.constant 0 : i32
    return %c0_i32, %c0_i32_0 : i32, i32
  }
  func.func @transform_3(%arg0: i32) -> (i32, i32) {
    %c0_i32 = arith.constant 0 : i32
    %c0_i32_0 = arith.constant 0 : i32
    %c0_i32_1 = arith.constant 0 : i32
    return %c0_i32, %c0_i32_0 : i32, i32
  }
  func.func @transform_4(%arg0: i32) -> (i32, i32) {
    %c0_i32 = arith.constant 0 : i32
    %c0_i32_0 = arith.constant 0 : i32
    %c0_i32_1 = arith.constant 0 : i32
    return %c0_i32, %c0_i32_0 : i32, i32
  }
  func.func @transform_5(%arg0: i32) -> (i32, i32) {
    %c0_i32 = arith.constant 0 : i32
    %c0_i32_0 = arith.constant 0 : i32
    %c0_i32_1 = arith.constant 0 : i32
    return %c0_i32, %c0_i32_0 : i32, i32
  }
  func.func @transform_6(%arg0: i32) -> (i32, i32) {
    %c0_i32 = arith.constant 0 : i32
    %c0_i32_0 = arith.constant 0 : i32
    %c0_i32_1 = arith.constant 0 : i32
    return %c0_i32, %c0_i32_0 : i32, i32
  }
  func.func @transform_7(%arg0: i32) -> (i32, i32) {
    %c0_i32 = arith.constant 0 : i32
    %c0_i32_0 = arith.constant 0 : i32
    %c0_i32_1 = arith.constant 0 : i32
    return %c0_i32, %c0_i32_0 : i32, i32
  }
  func.func @transform_8(%arg0: i32) -> (i32, i32) {
    %c0_i32 = arith.constant 0 : i32
    %c0_i32_0 = arith.constant 0 : i32
    %c0_i32_1 = arith.constant 0 : i32
    return %c0_i32, %c0_i32_0 : i32, i32
  }
  func.func @transform_9(%arg0: i32) -> (i32, i32) {
    %c0_i32 = arith.constant 0 : i32
    %c0_i32_0 = arith.constant 0 : i32
    %c0_i32_1 = arith.constant 0 : i32
    return %c0_i32, %c0_i32_0 : i32, i32
  }
  func.func @transform_10(%arg0: i32) -> (i32, i32) {
    %c0_i32 = arith.constant 0 : i32
    %c0_i32_0 = arith.constant 0 : i32
    %c0_i32_1 = arith.constant 0 : i32
    return %c0_i32, %c0_i32_0 : i32, i32
  }
  func.func @transform_11(%arg0: i32) -> (i32, i32) {
    %c0_i32 = arith.constant 0 : i32
    %c0_i32_0 = arith.constant 0 : i32
    %c0_i32_1 = arith.constant 0 : i32
    return %c0_i32, %c0_i32_0 : i32, i32
  }
  func.func @transform_12(%arg0: i32) -> (i32, i32) {
    %c0_i32 = arith.constant 0 : i32
    %c0_i32_0 = arith.constant 0 : i32
    return %c0_i32, %arg0 : i32, i32
  }
}

</mosaic_0001>

<bundles_post_ra>
// kernel: neumf_forward.1
= control target key start
LH: loop header
LB: loop body
LE: loop exit
PB: predicated region body
PF: predicated region fallthrough
CT: control target
= control target key end

     0   :  { %s892_s0 = inlined_call_operand.vmem [shape: f32[8,64], index: 0, kind: input, shape index: {}]   ;;  %s893_s1 = inlined_call_operand.vmem [shape: f32[8,64], index: 1, kind: input, shape index: {}]   ;;  %s894_s2 = inlined_call_operand.vmem [shape: f32[32,32], index: 2, kind: input, shape index: {}]   ;;  %s895_s3 = inlined_call_operand.vmem [shape: f32[32,32], index: 3, kind: input, shape index: {}]   ;;  %s896_s4 = inlined_call_operand.vmem [shape: f32[32,1], index: 4, kind: input, shape index: {}]   ;;  %s897_s5 = inlined_call_operand.vmem [shape: f32[16,32], index: 5, kind: input, shape index: {}]   ;;  %s898_s6 = inlined_call_operand.vmem [shape: f32[16,1], index: 6, kind: input, shape index: {}]   ;;  %s899_s7 = inlined_call_operand.vmem [shape: f32[8,16], index: 7, kind: input, shape index: {}]   ;;  %s900_s8 = inlined_call_operand.vmem [shape: f32[8,1], index: 8, kind: input, shape index: {}]   ;;  %s901_s9 = inlined_call_operand.vmem [shape: f32[8,1], index: 9, kind: input, shape index: {}]   ;;  %s902_s10 = inlined_call_operand.vmem [shape: f32[1,32], index: 10, kind: input, shape index: {}]   ;;  %s903_s11 = inlined_call_operand.<no memory space> [shape: f32[1,1], index: 11, kind: input, shape index: {}]   ;;  %s904_s12 = inlined_call_operand.hbm [shape: f32[1,8], index: 12, kind: output, shape index: {}]  }
   0x1   :  { %v17_v0 = vstv %s903_s11 }
   0x2   :  { %18 = vst [vmem:[#allocation2] sm:$0x1] %v17_v0 }
   0x3   :  { %v45_v1 = vld [vmem:[%s893_s1] sm:$0xff]  ;;  %vm54_vm0 = vcmask 261120   ;;  %v51_v4 = vld [vmem:[%s895_s3 + $0x8] sm:$0xff]  ;;  %v722_v5 = vmov 0   ;;  %v52_v6 = vld [vmem:[%s895_s3 + $0x10] sm:$0xff] }
   0x4   :  { %v50_v2 = vld [vmem:[%s895_s3] sm:$0xff]  ;;  %632 = vmatprep.subr.msk.mxu0 %vm54_vm0, %v45_v1  ;;  %692 = vset.pattern.permute.xlu0 %v722_v5  ;;  %v257_v8 = vld [vmem:[%s896_s4 + $0x10] sm:$0xff]  ;;  %v256_v9 = vld [vmem:[%s896_s4 + $0x8] sm:$0xff] }
   0x5   :  { %634 = vmatprep.mubr.msk.f32.mxu0 %vm54_vm0, %v50_v2  ;;  %v44_v3 = vld [vmem:[%s892_s0] sm:$0xff]  ;;  %633 = vmatpush3.xpose.msk.msra.mxu0 %vm54_vm0, %v45_v1  ;;  %v258_v10 = vld [vmem:[%s896_s4 + $0x18] sm:$0xff] }
   0x6   :  { %640 = vmatprep.subr.msk.mxu0 %vm54_vm0, %v44_v3  ;;  %v255_v7 = vld [vmem:[%s896_s4] sm:$0xff]  ;;  %693 = vset.pattern.permute.xlu1 %v722_v5  ;;  %v53_v11 = vld [vmem:[%s895_s3 + $0x18] sm:$0xff] }
   0x7   :  { %261 = vperm.xlu0 %692, %v255_v7   ;;  %271 = vperm.xlu1 %693, %v257_v8  }
   0x8   :  { %635 = vmatmul.mubr.msk.f32.vlgmr.msra.gmra.mrb[0].mxu0 %vm54_vm0, %v51_v4 }
   0x9   :  { %641 = vmatpush3.xpose.msk.msra.mxu0 %vm54_vm0, %v44_v3  ;;  %637 = vmatprep.mubr.msk.f32.mxu0 %vm54_vm0, %v52_v6 }
   0xa   :  { %19 = vsyncpa [#allocation4], 0  ;;  %v46_v12 = vld [vmem:[%s894_s2] sm:$0xff]  ;;  %v290_v14 = vld [vmem:[%s898_s6 + $0x8] sm:$0xff]  ;;  %v466_v17 = vmul.f32 %v45_v1, %v44_v3  ;;  %s723_s13 = smov 96   ;;  %v724_v42 = vmov 0.0|0.0   ;;  %v568_v0 = vlaneseq }
   0xb   :  { %266 = vperm.xlu0 %692, %v256_v9   ;;  %276 = vperm.xlu1 %693, %v258_v10   ;;  %v289_v13 = vld [vmem:[%s898_s6] sm:$0xff]  ;;  %v47_v15 = vld [vmem:[%s894_s2 + $0x8] sm:$0xff]  ;;  %v48_v16 = vld [vmem:[%s894_s2 + $0x10] sm:$0xff]  ;;  %vm725_vm1 = vmmov 0   ;;  %v726_v43 = vmov 0.0   ;;  %vm391_vm2 = vcmask 130048  }
   0xc   :  { %638 = vmatmul.mubr.msk.f32.gmra.mrb[2].mxu0 %vm54_vm0, %v53_v11  ;;  %v385_v18 = vld [vmem:[%s900_s8] sm:$0xff]  ;;  %v49_v19 = vld [vmem:[%s894_s2 + $0x18] sm:$0xff]  ;;  %v288_v41 = vld [vmem:[%s897_s5 + $0x8] sm:$0xff]  ;;  %vm474_vm3 = vcmask 64512   ;;  %v569_v5 = vshrl.u32 %v568_v0, 7  ;;  %vm579_vm4 = vcmask 57344  }
   0xd   :  { %642 = vmatprep.mubr.msk.f32.mxu0 %vm54_vm0, %v46_v12  ;;  %v467_v20 = vld [vmem:[%s901_s9] sm:$0xff] }
   0xe   :  { %v562_v21 = vld [vmem:[#allocation2] sm:$0x1]  ;;  %v570_v8 = vsub.s32 0, %v569_v5 }
   0xf   :  { %293 = vperm.xlu0 %692, %v289_v13   ;;  %298 = vperm.xlu1 %693, %v290_v14   ;;  %v287_v22 = vld [vmem:[%s897_s5] sm:$0xff] }
  0x10   :  { %643 = vmatmul.mubr.msk.f32.vlgmr.msra.gmra.mrb[0].mxu0 %vm54_vm0, %v47_v15  ;;  %656 = vmatprep.mubr.msk.f32.mxu1 %vm54_vm0, %v287_v22  ;;  %v384_v53 = vld [vmem:[%s899_s7] sm:$0xff]  ;;  %s727_s7 = smov [#allocation3]  }
  0x11   :  { %645 = vmatprep.mubr.msk.f32.mxu0 %vm54_vm0, %v48_v16  ;;  %v482_v55 = vld [vmem:[%s902_s10] sm:$0x1]  ;;  %s587_s10 = sshll.u32 %s727_s7, 4  ;;  %s588_s10 = int_to_ptr.vmem [resolvable:$true] %s587_s10 }
  0x12   :  { %s698_s19 = scalar_lea.vmem %s588_s10, 16  ;;  %s702_s20 = scalar_lea.vmem %s588_s10, 32 }
  0x13   :  { %484 = vrot.lane.b32.xlu0 %v466_v17, %s723_s13  ;;  %388 = vperm.xlu1 %693, %v385_v18   ;;  %p699_p0 = scmp.ne.s32.totalorder %s588_s10, %s698_s19  ;;  %p703_p1 = scmp.lt.s32.totalorder %s588_s10, %s588_s10 }
  0x14   :  { %646 = vmatmul.mubr.msk.f32.gmra.mrb[2].mxu0 %vm54_vm0, %v49_v19  ;;  %p704_p2 = scmp.lt.s32.totalorder %s702_s20, %s698_s19 }
  0x16   :  { %p705_p3 = por %p704_p2, %p703_p1 }
  0x17   :  { %470 = vperm.xlu0 %692, %v467_v20   ;;  %565 = vperm.xlu1 %693, %v562_v21  }
  0x18   :  { %p706_p4 = pnand %p705_p3, %p699_p0 }
  0x86   :  { %v262_v23 = vpop.permute.xlu0 %261  ;;  %v272_v24 = vpop.permute.xlu1 %271 }
  0x8a   :  { %v267_v25 = vpop.permute.xlu0 %266  ;;  %v277_v31 = vpop.permute.xlu1 %276 }
  0x8e   :  { %v299_v44 = vpop.permute.xlu1 %298  ;;  %v294_v46 = vpop.permute.xlu0 %293 }
  0x92   :  { %v485_v54 = vpop.permute.xlu0 %484  ;;  %v389_v56 = vpop.permute.xlu1 %388 }
  0x96   :  { %v471_v61 = vpop.permute.xlu0 %470  ;;  %v566_v10 = vpop.permute.xlu1 %565 }
  0x97   :  { %v571_v12 = vrot.slane %v566_v10, %v570_v8 }
  0xe3   :  { %v644_v26 = vpop.f32.mrb[0].mxu0 }
  0xe4   :  { %v280_v27 = vadd.f32 %v644_v26, %v267_v25  ;;  %v236_v28 = vpop.f32.mrb[1].mxu0 }
  0xe5   :  { %v279_v29 = vadd.f32 %v262_v23, %v236_v28 }
  0xe6   :  { %v284_v30 = vmax.f32 %v280_v27, 0.0 }
  0xe7   :  { %v283_v32 = vmax.f32 %v279_v29, 0.0  ;;  %v647_v33 = vpop.f32.mrb[2].mxu0 }
  0xe8   :  { %v282_v34 = vadd.f32 %v647_v33, %v277_v31  ;;  %v246_v35 = vpop.f32.mrb[3].mxu0 }
  0xe9   :  { %v281_v36 = vadd.f32 %v272_v24, %v246_v35  ;;  %v671_v37 = vpack.c.bf16 %v284_v30, %v283_v32 }
  0xea   :  { %v286_v38 = vmax.f32 %v282_v34, 0.0 }
  0xeb   :  { %v285_v39 = vmax.f32 %v281_v36, 0.0  ;;  %672 = vmatprep.subr.bf16.mxu1 %v671_v37 }
  0xec   :  { %674 = vmatpush3.bf16.msra.mxu1 %v671_v37 }
  0xed   :  { %v675_v40 = vpack.c.bf16 %v286_v38, %v285_v39 }
  0xef   :  { %676 = vmatprep.subr.bf16.mxu1 %v675_v40 }
  0xf0   :  { %678 = vmatpush3.bf16.msra.mxu1 %v675_v40 }
  0xf1   :  { %679 = vmatprep.subr.bf16.mxu1 %v724_v42 }
  0xf3   :  { %657 = vmatmul.mubr.msk.f32.vlgmr.msra.gmra.mrb[0].mxu1 %vm54_vm0, %v288_v41 }
  0xf4   :  { %663 = vmatprep.mubr.msk.f32.mxu1 %vm725_vm1, %v726_v43 }
 0x1c6   :  { %v658_v45 = vpop.f32.mrb[0].mxu1 }
 0x1c7   :  { %v379_v47 = vadd.f32 %v658_v45, %v299_v44  ;;  %v373_v48 = vpop.f32.mrb[1].mxu1 }
 0x1c8   :  { %v374_v49 = vadd.f32 %v373_v48, %v294_v46 }
 0x1c9   :  { %v383_v50 = vmax.f32 %v379_v47, 0.0 }
 0x1ca   :  { %v382_v51 = vmax.f32 %v374_v49, 0.0 }
 0x1cc   :  { %v680_v52 = vpack.c.bf16 %v383_v50, %v382_v51 }
 0x1ce   :  { %681 = vmatpush3.bf16.msra.mxu1 %v680_v52 }
 0x1cf   :  { %666 = vmatprep.subr.mxu1 %v726_v43 }
 0x1d1   :  { %664 = vmatmul.mubr.msk.f32.vlgmr.msra.gmra.mrb[2].mxu1 %vm391_vm2, %v384_v53 }
 0x1d2   :  { %668 = vmatprep.mubr.msk.f32.mxu1 %vm725_vm1, %v726_v43 }
 0x1d7   :  { %667 = vmatpush3.xpose.msk.msra.mxu1 %vm54_vm0, %v485_v54 }
 0x1da   :  { %669 = vmatmul.mubr.msk.f32.vlgmr.msra.gmra.mrb[4].mxu1 %vm54_vm0, %v482_v55 }
 0x2a4   :  { %v461_v57 = vpop.f32.mrb[2].mxu1 }
 0x2a5   :  { %v462_v58 = vadd.f32 %v461_v57, %v389_v56  ;;  %v665_v59 = vpop.f32.mrb[3].mxu1 }
 0x2a7   :  { %v465_v60 = vmax.f32 %v462_v58, 0.0 }
 0x2a9   :  { %v473_v62 = vmul.f32 %v471_v61, %v465_v60 }
 0x2ab   :  { %v475_v63 = vsel %vm474_vm3, %v473_v62, 0.0 }
 0x2ac   :  { %v476_v1 = vrot.slane %v475_v63, 4 }
 0x2ad   :  { %v557_v2 = vpop.f32.mrb[4].mxu1 }
 0x2ae   :  { %v477_v3 = vadd.f32 %v476_v1, %v475_v63  ;;  %v670_v4 = vpop.f32.mrb[5].mxu1 }
 0x2b0   :  { %v478_v6 = vrot.slane %v477_v3, 2 }
 0x2b2   :  { %v479_v7 = vadd.f32 %v478_v6, %v477_v3 }
 0x2b4   :  { %v480_v9 = vrot.slane %v479_v7, 1 }
 0x2b6   :  { %v481_v11 = vadd.f32 %v480_v9, %v479_v7 }
 0x2b8   :  { %v561_v13 = vadd.f32 %v557_v2, %v481_v11 }
 0x2ba   :  { %v572_v14 = vadd.f32 %v571_v12, %v561_v13 }
 0x2bc   :  { %v610_v15 = vmul.f32 -1.442695, %v572_v14 }
 0x2be   :  { %694 = vpow2.f32 %v610_v15 }
 0x2c8   :  { %v695_v16 = vpop.eup %694 }
 0x2c9   :  { %v576_v17 = vadd.f32 1.0, %v695_v16 }
 0x2cb   :  { %696 = vrcp.f32 %v576_v17 }
 0x2d5   :  { %v697_v18 = vpop.eup %696 }
 0x2d6   :  { %580 = vst.msk [vmem:[#allocation3] sm:$0x1] %vm579_vm4, %v697_v18 }
 0x2d7   :  { %709 = shalt.err (!%p706_p4)
}
 0x2d8   :  { %s710_s23 = scalar_lea.hbm %s904_s12, 16 }
 0x2d9   :  { %p711_p5 = scmp.ne.s32.totalorder %s904_s12, %s710_s23  ;;  %p714_p6 = scmp.lt.u32.totalorder %s710_s23, %s904_s12 }
 0x2db   :  { %p716_p7 = pnand %p714_p6, %p711_p5 }
 0x2dd   :  { %719 = shalt.err (!%p716_p7)
}
 0x2de   :  { %590 = dma.vmem_to_hbm [thread:$0]  %s588_s10, 16, %s904_s12, [#allocation4]  }
 0x2df   :  { %720 = dma.done.wait [#allocation4], 16  }
 0x2e0   :  { %721 = vsyncadd [#allocation4], 4294967280 }
 0x2e1   :  { %594 = vsyncpa [#allocation4], 1 }

</bundles_post_ra>
